<compile_context>
chip_gen: v6e
topology: v6e:2x2x1
jax: 0.10.0
libtpu: 0.0.40
codegen_flags: <defaults>
</compile_context>

<pallas_src>
import functools

import jax
import jax.numpy as jnp
from jax.experimental import pallas as pl
from jax.experimental.pallas import tpu as pltpu


def _round_up(x, m):
    return (x + m - 1) // m * m


def _pad_to(a, shape):
    pads = [(0, s - d) for d, s in zip(a.shape, shape)]
    if all(p == (0, 0) for p in pads):
        return a
    return jnp.pad(a, pads)


def _device_kind():
    try:
        return jax.devices()[0].device_kind.lower()
    except Exception:
        return ""


def _is_pre_v6():
    # v5e and older: no bf16 VPU/EUP, 128x128 MXUs.
    k = _device_kind()
    return any(tag in k for tag in ("v2", "v3", "v4", "v5"))


def _vmem_capacity_bytes():
    try:
        return int(pltpu.get_tpu_info().vmem_capacity_bytes)
    except Exception:
        pass
    k = _device_kind()
    if _is_pre_v6() or "v6" in k:
        return 128 << 20          # v5e / v6e: 128 MiB physical VMEM
    return 64 << 20               # conservative (v7x: 64 MiB per TensorCore)


def value_fn_kernel(x_ref, w1_ref, b1_ref, w2_ref, b2_ref, w3_ref, b3_ref,
                    out_ref, *, compute_dtype, act_dtype):
    # x tile is the only per-step HBM stream; cast only it if needed (weights
    # are already in compute_dtype from the wrapper).
    x = x_ref[...]
    if x.dtype != compute_dtype:
        x = x.astype(compute_dtype)

    # fc1: MXU matmul with f32 accumulation, f32 bias-add.
    h1 = jnp.dot(x, w1_ref[...], preferred_element_type=jnp.float32) + b1_ref[...]
    # tanh on the EUP: bf16 on v6e/v7x (~2x transcendental throughput), f32 on v5e.
    h1 = jnp.tanh(h1.astype(act_dtype))
    if h1.dtype != compute_dtype:
        h1 = h1.astype(compute_dtype)

    # fc2
    h2 = jnp.dot(h1, w2_ref[...], preferred_element_type=jnp.float32) + b2_ref[...]
    h2 = jnp.tanh(h2.astype(act_dtype))

    # fc3: (tb, E) @ (E, 1) would occupy a single MXU output column -> do a
    # VPU multiply + XLU lane reduction (otherwise-idle slots) in f32 instead.
    vf = jnp.sum(h2.astype(jnp.float32) * w3_ref[...], axis=-1, keepdims=True)
    out_ref[...] = (vf + b3_ref[...]).astype(out_ref.dtype)


def value_function(x, params, *, compute_dtype=jnp.bfloat16, block_batch=1024):
    """Pallas forward pass of ValueFunction.

    x: (batch, obs_dim), f32 or bf16
    params: dict with w1 (obs_dim, embed), b1 (1, embed),
                      w2 (embed, embed),   b2 (1, embed),
                      w3 (embed, 1),       b3 (1, 1)   (all f32)
    returns: (batch, 1) float32
    """
    batch, obs_dim = x.shape
    embed_dim = params["w1"].shape[1]

    compute_dtype = jnp.dtype(compute_dtype)
    pre_v6 = _is_pre_v6()
    # bf16 tanh only where the EUP supports it (v6e / v7x); f32 elsewhere.
    act_dtype = (compute_dtype
                 if (compute_dtype == jnp.bfloat16 and not pre_v6)
                 else jnp.dtype(jnp.float32))

    # Lane-align embed dim: 256 on v6e/v7x when the kernel is MXU-bound
    # (large embed), 128 otherwise / on v5e.  obs_dim is never padded (the x
    # stream is the dominant HBM traffic in the mem-bound regime).
    lane = 256 if (embed_dim >= 256 and not pre_v6) else 128
    emb_p = _round_up(embed_dim, lane)

    in_dtype = x.dtype
    ib = jnp.dtype(in_dtype).itemsize
    cb = compute_dtype.itemsize
    ab = act_dtype.itemsize
    row_align = 8 if ib >= 4 else 16

    def vmem_est(t):
        x_io = 2 * t * obs_dim * ib + 2 * t * 4                 # double-buffered x / out tiles
        weights = ((obs_dim * emb_p + emb_p * emb_p) * cb       # single-buffered (Buffered(1))
                   + (3 * emb_p + 1) * 4)                       # f32 biases + w3 row
        inter = t * emb_p * (2 * 4 + 2 * ab) + t * obs_dim * cb  # f32 matmul outs + activations + x cast
        return x_io + weights + inter

    capacity = _vmem_capacity_bytes()
    # ~96 MiB budget on v5e/v6e, ~32 MiB on v7x.
    budget = min(max(capacity - (32 << 20), 16 << 20), 100 << 20)

    # Tile the batch: balanced tiles (no ~2x padding when batch is just above a
    # multiple of block_batch); force >= 2 even blocks where possible so the
    # "parallel" axis shards over both v7x TensorCores; shrink until the VMEM
    # estimate fits the generation-aware budget.
    n_blocks = pl.cdiv(batch, block_batch)
    if batch >= 2 * row_align:
        n_blocks = max(n_blocks, 2)
    if n_blocks > 1 and n_blocks % 2:
        n_blocks += 1
    tb = _round_up(pl.cdiv(batch, n_blocks), row_align)
    while tb > row_align and vmem_est(tb) > budget:
        n_blocks *= 2
        tb = _round_up(pl.cdiv(batch, n_blocks), row_align)
    padded_batch = n_blocks * tb

    # Pad (zero padding is exact for a tanh MLP) and cast weights ONCE here.
    xp = _pad_to(x, (padded_batch, obs_dim))                       # keep incoming dtype
    w1 = _pad_to(params["w1"], (obs_dim, emb_p)).astype(compute_dtype)
    b1 = _pad_to(params["b1"].reshape(1, -1), (1, emb_p)).astype(jnp.float32)
    w2 = _pad_to(params["w2"], (emb_p, emb_p)).astype(compute_dtype)
    b2 = _pad_to(params["b2"].reshape(1, -1), (1, emb_p)).astype(jnp.float32)
    w3 = _pad_to(params["w3"].reshape(1, -1), (1, emb_p)).astype(jnp.float32)
    b3 = params["b3"].reshape(1, 1).astype(jnp.float32)

    const = lambda i: (0, 0)
    resident = pl.Buffered(1)   # constant block index -> no double-buffering

    kernel = functools.partial(value_fn_kernel,
                               compute_dtype=compute_dtype, act_dtype=act_dtype)

    vmem_limit = int(min(capacity - (4 << 20),
                         max(32 << 20, vmem_est(tb) + (8 << 20))))

    out = pl.pallas_call(
        kernel,
        out_shape=jax.ShapeDtypeStruct((padded_batch, 1), jnp.float32),
        grid=(n_blocks,),
        in_specs=[
            pl.BlockSpec((tb, obs_dim), lambda i: (i, 0)),                     # x: streamed over batch
            pl.BlockSpec((obs_dim, emb_p), const, pipeline_mode=resident),     # w1 (resident)
            pl.BlockSpec((1, emb_p), const, pipeline_mode=resident),           # b1
            pl.BlockSpec((emb_p, emb_p), const, pipeline_mode=resident),       # w2
            pl.BlockSpec((1, emb_p), const, pipeline_mode=resident),           # b2
            pl.BlockSpec((1, emb_p), const, pipeline_mode=resident),           # w3 row
            pl.BlockSpec((1, 1), const, pipeline_mode=resident),               # b3
        ],
        out_specs=pl.BlockSpec((tb, 1), lambda i: (i, 0)),
        compiler_params=pltpu.CompilerParams(
            dimension_semantics=("parallel",),
            vmem_limit_bytes=vmem_limit,
        ),
        cost_estimate=pl.CostEstimate(
            flops=2 * padded_batch * (obs_dim * emb_p + emb_p * emb_p + emb_p),
            transcendentals=2 * padded_batch * emb_p,
            bytes_accessed=(padded_batch * obs_dim * ib
                            + (obs_dim * emb_p + emb_p * emb_p) * cb
                            + (3 * emb_p + 1) * 4
                            + padded_batch * 4),
        ),
    )(xp, w1, b1, w2, b2, w3, b3)

    return out[:batch]


def init_params(key, obs_dim, embed_dim):
    """Deterministic synthetic parameters (shapes match the torch module)."""
    ks = jax.random.split(key, 6)
    scale = 0.1
    return {
        # torch Linear weight is (out, in); we store (in, out) for x @ W.
        "w1": scale * jax.random.normal(ks[0], (obs_dim, embed_dim), jnp.float32),
        "b1": scale * jax.random.normal(ks[1], (1, embed_dim), jnp.float32),
        "w2": scale * jax.random.normal(ks[2], (embed_dim, embed_dim), jnp.float32),
        "b2": scale * jax.random.normal(ks[3], (1, embed_dim), jnp.float32),
        "w3": scale * jax.random.normal(ks[4], (embed_dim, 1), jnp.float32),
        "b3": scale * jax.random.normal(ks[5], (1, 1), jnp.float32),
    }


def value_function_ref(x, p):
    h1 = jnp.tanh(x @ p["w1"] + p["b1"])
    h2 = jnp.tanh(h1 @ p["w2"] + p["b2"])
    return h2 @ p["w3"] + p["b3"]


if __name__ == "__main__":
    key = jax.random.PRNGKey(0)
    k_x, k_p = jax.random.split(key)

    batch, obs_dim, embed_dim = 8, 16, 32
    x = jax.random.normal(k_x, (batch, obs_dim), jnp.float32)
    params = init_params(k_p, obs_dim, embed_dim)

    ref = value_function_ref(x, params)

    # f32 path: exact semantics of the torch module.
    vf_f32 = jax.block_until_ready(
        jax.jit(functools.partial(value_function, compute_dtype=jnp.float32))(x, params))
    assert vf_f32.shape == (batch, 1), vf_f32.shape
    assert jnp.allclose(vf_f32, ref, atol=1e-5, rtol=1e-5), "f32 mismatch vs reference"

    # Default production path: bf16 MXU operands, f32 accumulation,
    # generation-gated bf16 tanh.
    vf = jax.block_until_ready(jax.jit(value_function)(x, params))
    assert vf.shape == (batch, 1), vf.shape
    assert jnp.allclose(vf, ref, atol=5e-2, rtol=5e-2), "bf16 mismatch vs reference"

    # Multi-block path: non-tile-multiple batch exercises balanced tiling,
    # batch padding/slicing, and the 2-block "parallel" grid.
    batch2 = 50
    x2 = jax.random.normal(k_x, (batch2, obs_dim), jnp.float32)
    ref2 = value_function_ref(x2, params)
    vf2 = jax.block_until_ready(jax.jit(value_function)(x2, params))
    assert vf2.shape == (batch2, 1), vf2.shape
    assert jnp.allclose(vf2, ref2, atol=5e-2, rtol=5e-2), "multi-block mismatch vs reference"

    print("KERNEL_OK")
</pallas_src>

<mosaic_0001>
module attributes {stable_mosaic.version = 11 : i64} {
  func.func @value_fn_kernel(%arg0: i32, %arg1: memref<8x16xf32, #tpu.memory_space<vmem>>, %arg2: memref<16x128xf32, #tpu.memory_space<vmem>>, %arg3: memref<1x128xf32, #tpu.memory_space<vmem>>, %arg4: memref<128x128xf32, #tpu.memory_space<vmem>>, %arg5: memref<1x128xf32, #tpu.memory_space<vmem>>, %arg6: memref<1x128xf32, #tpu.memory_space<vmem>>, %arg7: memref<1x1xf32, #tpu.memory_space<vmem>>, %arg8: memref<8x1xf32, #tpu.memory_space<vmem>>) attributes {dimension_semantics = [#tpu.dimension_semantics<parallel>], iteration_bounds = array<i64: 1>, scalar_prefetch = 0 : i64, scratch_operands = 0 : i64, tpu.core_type = #tpu.core_type<tc>, window_params = [{transform_indices = @transform_0, window_bounds = array<i64: 8, 16>}, {pipeline_mode = #tpu.pipeline_mode<synchronous>, transform_indices = @transform_1, window_bounds = array<i64: 16, 128>}, {pipeline_mode = #tpu.pipeline_mode<synchronous>, transform_indices = @transform_2, window_bounds = array<i64: 1, 128>}, {pipeline_mode = #tpu.pipeline_mode<synchronous>, transform_indices = @transform_3, window_bounds = array<i64: 128, 128>}, {pipeline_mode = #tpu.pipeline_mode<synchronous>, transform_indices = @transform_4, window_bounds = array<i64: 1, 128>}, {pipeline_mode = #tpu.pipeline_mode<synchronous>, transform_indices = @transform_5, window_bounds = array<i64: 1, 128>}, {pipeline_mode = #tpu.pipeline_mode<synchronous>, transform_indices = @transform_6, window_bounds = array<i64: 1, 1>}, {transform_indices = @transform_7, window_bounds = array<i64: 8, 1>}]} {
    %c0 = arith.constant 0 : index
    %c0_0 = arith.constant 0 : index
    %0 = vector.load %arg1[%c0, %c0_0] : memref<8x16xf32, #tpu.memory_space<vmem>>, vector<8x16xf32>
    %c0_1 = arith.constant 0 : index
    %c0_2 = arith.constant 0 : index
    %1 = vector.load %arg2[%c0_1, %c0_2] : memref<16x128xf32, #tpu.memory_space<vmem>>, vector<16x128xf32>
    %cst = arith.constant dense<0.000000e+00> : vector<8x128xf32>
    %2 = tpu.matmul %0, %1, %cst {dimension_numbers = #tpu.dot_dimension_numbers<[1], [0], [0], [1], [0, 0, 1, 1], [], []>} : vector<8x16xf32>, vector<16x128xf32>, vector<8x128xf32> -> vector<8x128xf32>
    %c0_3 = arith.constant 0 : index
    %c0_4 = arith.constant 0 : index
    %3 = vector.load %arg3[%c0_3, %c0_4] : memref<1x128xf32, #tpu.memory_space<vmem>>, vector<1x128xf32>
    %4 = vector.broadcast %3 : vector<1x128xf32> to vector<8x128xf32>
    %5 = arith.addf %2, %4 : vector<8x128xf32>
    %6 = math.tanh %5 : vector<8x128xf32>
    %c0_5 = arith.constant 0 : index
    %c0_6 = arith.constant 0 : index
    %7 = vector.load %arg4[%c0_5, %c0_6] : memref<128x128xf32, #tpu.memory_space<vmem>>, vector<128x128xf32>
    %cst_7 = arith.constant dense<0.000000e+00> : vector<8x128xf32>
    %8 = tpu.matmul %6, %7, %cst_7 {dimension_numbers = #tpu.dot_dimension_numbers<[1], [0], [0], [1], [0, 0, 1, 1], [], []>} : vector<8x128xf32>, vector<128x128xf32>, vector<8x128xf32> -> vector<8x128xf32>
    %c0_8 = arith.constant 0 : index
    %c0_9 = arith.constant 0 : index
    %9 = vector.load %arg5[%c0_8, %c0_9] : memref<1x128xf32, #tpu.memory_space<vmem>>, vector<1x128xf32>
    %10 = vector.broadcast %9 : vector<1x128xf32> to vector<8x128xf32>
    %11 = arith.addf %8, %10 : vector<8x128xf32>
    %12 = math.tanh %11 : vector<8x128xf32>
    %c0_10 = arith.constant 0 : index
    %c0_11 = arith.constant 0 : index
    %13 = vector.load %arg6[%c0_10, %c0_11] : memref<1x128xf32, #tpu.memory_space<vmem>>, vector<1x128xf32>
    %14 = vector.broadcast %13 : vector<1x128xf32> to vector<8x128xf32>
    %15 = arith.mulf %12, %14 : vector<8x128xf32>
    %cst_12 = arith.constant dense<0.000000e+00> : vector<8xf32>
    %16 = vector.multi_reduction <add>, %15, %cst_12 [1] : vector<8x128xf32> to vector<8xf32>
    %17 = vector.shape_cast %16 : vector<8xf32> to vector<8x1xf32>
    %c0_13 = arith.constant 0 : index
    %c0_14 = arith.constant 0 : index
    %18 = vector.load %arg7[%c0_13, %c0_14] : memref<1x1xf32, #tpu.memory_space<vmem>>, vector<1x1xf32>
    %19 = vector.broadcast %18 : vector<1x1xf32> to vector<8x1xf32>
    %20 = arith.addf %17, %19 : vector<8x1xf32>
    %c0_15 = arith.constant 0 : index
    %c0_16 = arith.constant 0 : index
    %21 = vector.load %arg8[%c0_15, %c0_16] : memref<8x1xf32, #tpu.memory_space<vmem>>, vector<8x1xf32>
    tpu.vector_store %arg8[%c0_15, %c0_16], %20 {strides = array<i32>} : memref<8x1xf32, #tpu.memory_space<vmem>>, vector<8x1xf32>,
    return
  }
  func.func @transform_0(%arg0: i32) -> (i32, i32) {
    %c0_i32 = arith.constant 0 : i32
    %c0_i32_0 = arith.constant 0 : i32
    return %arg0, %c0_i32 : i32, i32
  }
  func.func @transform_1(%arg0: i32) -> (i32, i32) {
    %c0_i32 = arith.constant 0 : i32
    %c0_i32_0 = arith.constant 0 : i32
    %c0_i32_1 = arith.constant 0 : i32
    return %c0_i32, %c0_i32_0 : i32, i32
  }
  func.func @transform_2(%arg0: i32) -> (i32, i32) {
    %c0_i32 = arith.constant 0 : i32
    %c0_i32_0 = arith.constant 0 : i32
    %c0_i32_1 = arith.constant 0 : i32
    return %c0_i32, %c0_i32_0 : i32, i32
  }
  func.func @transform_3(%arg0: i32) -> (i32, i32) {
    %c0_i32 = arith.constant 0 : i32
    %c0_i32_0 = arith.constant 0 : i32
    %c0_i32_1 = arith.constant 0 : i32
    return %c0_i32, %c0_i32_0 : i32, i32
  }
  func.func @transform_4(%arg0: i32) -> (i32, i32) {
    %c0_i32 = arith.constant 0 : i32
    %c0_i32_0 = arith.constant 0 : i32
    %c0_i32_1 = arith.constant 0 : i32
    return %c0_i32, %c0_i32_0 : i32, i32
  }
  func.func @transform_5(%arg0: i32) -> (i32, i32) {
    %c0_i32 = arith.constant 0 : i32
    %c0_i32_0 = arith.constant 0 : i32
    %c0_i32_1 = arith.constant 0 : i32
    return %c0_i32, %c0_i32_0 : i32, i32
  }
  func.func @transform_6(%arg0: i32) -> (i32, i32) {
    %c0_i32 = arith.constant 0 : i32
    %c0_i32_0 = arith.constant 0 : i32
    %c0_i32_1 = arith.constant 0 : i32
    return %c0_i32, %c0_i32_0 : i32, i32
  }
  func.func @transform_7(%arg0: i32) -> (i32, i32) {
    %c0_i32 = arith.constant 0 : i32
    %c0_i32_0 = arith.constant 0 : i32
    return %arg0, %c0_i32 : i32, i32
  }
}

</mosaic_0001>

<bundles_post_ra>
// kernel: value_function.1
= control target key start
LH: loop header
LB: loop body
LE: loop exit
PB: predicated region body
PF: predicated region fallthrough
CT: control target
= control target key end

     0   :  { %v304_v0 = vmov 0.0   ;;  %vm305_vm0 = vmmov 0   ;;  %vm38_vm1 = vcmask 130048   ;;  %vm225_vm2 = vcmask 7168   ;;  %s420_s1 = inlined_call_operand.vmem [shape: f32[16,128], index: 1, kind: input, shape index: {}]   ;;  %s421_s0 = inlined_call_operand.vmem [shape: f32[8,16], index: 0, kind: input, shape index: {}]   ;;  %s422_s3 = inlined_call_operand.vmem [shape: f32[128,128], index: 3, kind: input, shape index: {}]   ;;  %s423_s2 = inlined_call_operand.vmem [shape: f32[1,128], index: 2, kind: input, shape index: {}]   ;;  %s424_s6 = inlined_call_operand.<no memory space> [shape: f32[1,1], index: 6, kind: input, shape index: {}]   ;;  %s425_s4 = inlined_call_operand.vmem [shape: f32[1,128], index: 4, kind: input, shape index: {}]   ;;  %s426_s5 = inlined_call_operand.vmem [shape: f32[1,128], index: 5, kind: input, shape index: {}]   ;;  %s427_s7 = inlined_call_operand.vmem [shape: f32[8,1], index: 7, kind: output, shape index: {}]  }
   0x1   :  { %256 = vmatprep.subr.mxu0 %v304_v0  ;;  %v30_v1 = vld [vmem:[%s420_s1 + $0x8] sm:$0xff]  ;;  %v29_v2 = vld [vmem:[%s420_s1] sm:$0xff]  ;;  %260 = vmatprep.mubr.msk.f32.mxu0 %vm305_vm0, %v304_v0  ;;  %v128_v4 = vld [vmem:[%s422_s3 + $0x78] sm:$0xff]  ;;  %v12_v25 = vstv %s424_s6 }
   0x2   :  { %257 = vmatpush3.msra.mxu0 %v30_v1  ;;  %v28_v3 = vld [vmem:[%s421_s0] sm:$0xff]  ;;  %263 = vmatprep.subr.mxu1 %v304_v0  ;;  %v127_v5 = vld [vmem:[%s422_s3 + $0x70] sm:$0xff]  ;;  %v126_v6 = vld [vmem:[%s422_s3 + $0x68] sm:$0xff]  ;;  %13 = vst [vmem:[#allocation2] sm:$0x1] %v12_v25 }
   0x3   :  { %258 = vmatprep.subr.mxu0 %v304_v0  ;;  %264 = vmatpush3.msra.mxu1 %v128_v4  ;;  %v125_v7 = vld [vmem:[%s422_s3 + $0x60] sm:$0xff]  ;;  %v124_v8 = vld [vmem:[%s422_s3 + $0x58] sm:$0xff]  ;;  %v123_v9 = vld [vmem:[%s422_s3 + $0x50] sm:$0xff] }
   0x4   :  { %259 = vmatpush3.msra.mxu0 %v29_v2  ;;  %265 = vmatprep.subr.mxu1 %v304_v0  ;;  %v122_v10 = vld [vmem:[%s422_s3 + $0x48] sm:$0xff]  ;;  %v121_v11 = vld [vmem:[%s422_s3 + $0x40] sm:$0xff]  ;;  %v120_v12 = vld [vmem:[%s422_s3 + $0x38] sm:$0xff] }
   0x5   :  { %261 = vmatmul.mubr.msk.f32.vlgmr.msra.gmra.mxu0 %vm38_vm1, %v28_v3  ;;  %266 = vmatpush3.msra.mxu1 %v127_v5  ;;  %v119_v13 = vld [vmem:[%s422_s3 + $0x30] sm:$0xff]  ;;  %v118_v14 = vld [vmem:[%s422_s3 + $0x28] sm:$0xff]  ;;  %v117_v15 = vld [vmem:[%s422_s3 + $0x20] sm:$0xff] }
   0x6   :  { %267 = vmatprep.subr.mxu1 %v304_v0  ;;  %295 = vmatprep.mubr.msk.f32.mxu1 %vm305_vm0, %v304_v0  ;;  %v116_v16 = vld [vmem:[%s422_s3 + $0x18] sm:$0xff]  ;;  %v115_v17 = vld [vmem:[%s422_s3 + $0x10] sm:$0xff]  ;;  %v114_v18 = vld [vmem:[%s422_s3 + $0x8] sm:$0xff] }
   0x7   :  { %268 = vmatpush3.msra.mxu1 %v126_v6  ;;  %v113_v19 = vld [vmem:[%s422_s3] sm:$0xff] }
   0x8   :  { %269 = vmatprep.subr.mxu1 %v304_v0  ;;  %v231_v20 = vld [vmem:[%s423_s2] ss:$0 sm:$0xff] }
   0x9   :  { %270 = vmatpush3.msra.mxu1 %v125_v7  ;;  %v233_v26 = vld [vmem:[%s425_s4] ss:$0 sm:$0xff] }
   0xa   :  { %271 = vmatprep.subr.mxu1 %v304_v0  ;;  %v234_v30 = vld [vmem:[%s426_s5] ss:$0 sm:$0xff] }
   0xb   :  { %272 = vmatpush3.msra.mxu1 %v124_v8  ;;  %v235_v33 = vld [vmem:[#allocation2] ss:$0 sm:$0xff] }
   0xc   :  { %273 = vmatprep.subr.mxu1 %v304_v0 }
   0xd   :  { %274 = vmatpush3.msra.mxu1 %v123_v9 }
   0xe   :  { %275 = vmatprep.subr.mxu1 %v304_v0 }
   0xf   :  { %276 = vmatpush3.msra.mxu1 %v122_v10 }
  0x10   :  { %277 = vmatprep.subr.mxu1 %v304_v0 }
  0x11   :  { %278 = vmatpush3.msra.mxu1 %v121_v11 }
  0x12   :  { %279 = vmatprep.subr.mxu1 %v304_v0 }
  0x13   :  { %280 = vmatpush3.msra.mxu1 %v120_v12 }
  0x14   :  { %281 = vmatprep.subr.mxu1 %v304_v0 }
  0x15   :  { %282 = vmatpush3.msra.mxu1 %v119_v13 }
  0x16   :  { %283 = vmatprep.subr.mxu1 %v304_v0 }
  0x17   :  { %284 = vmatpush3.msra.mxu1 %v118_v14 }
  0x18   :  { %285 = vmatprep.subr.mxu1 %v304_v0 }
  0x19   :  { %286 = vmatpush3.msra.mxu1 %v117_v15 }
  0x1a   :  { %287 = vmatprep.subr.mxu1 %v304_v0 }
  0x1b   :  { %288 = vmatpush3.msra.mxu1 %v116_v16 }
  0x1c   :  { %289 = vmatprep.subr.mxu1 %v304_v0 }
  0x1d   :  { %290 = vmatpush3.msra.mxu1 %v115_v17 }
  0x1e   :  { %291 = vmatprep.subr.mxu1 %v304_v0 }
  0x1f   :  { %292 = vmatpush3.msra.mxu1 %v114_v18 }
  0x20   :  { %293 = vmatprep.subr.mxu1 %v304_v0 }
  0x21   :  { %294 = vmatpush3.msra.mxu1 %v113_v19 }
  0xc5   :  { %v108_v21 = vpop.f32.mrf.mxu0 }
  0xc6   :  { %v109_v22 = vadd.f32 %v231_v20, %v108_v21 }
  0xc7   :  { %v262_v23 = vpop.f32.mrf.mxu0 }
  0xc8   :  { %300 = vtanh.f32 %v109_v22 }
  0xd5   :  { %v301_v24 = vpop.eup %300 }
  0xd6   :  { %296 = vmatmul.mubr.f32.vlgmr.msra.gmra.mxu1 %v301_v24 }
 0x196   :  { %v202_v27 = vpop.f32.mrf.mxu1 }
 0x197   :  { %v203_v28 = vadd.f32 %v233_v26, %v202_v27 }
 0x198   :  { %v297_v29 = vpop.f32.mrf.mxu1 }
 0x199   :  { %302 = vtanh.f32 %v203_v28 }
 0x1a6   :  { %v303_v31 = vpop.eup %302 }
 0x1a7   :  { %v214_v32 = vmul.f32 %v303_v31, %v234_v30 }
 0x1a9   :  { %215 = vadd.xlane.f32.xlu0 %v214_v32 }
 0x232   :  { %v216_v34 = vpop.xlane.xlu0 %215 }
 0x233   :  { %v224_v35 = vadd.f32 %v235_v33, %v216_v34 }
 0x235   :  { %226 = vst.msk [vmem:[%s427_s7] sm:$0xff] %vm225_vm2, %v224_v35 }

</bundles_post_ra>
